<compile_context>
chip_gen: v7x
topology: tpu7x:2x2x1
jax: 0.10.0
libtpu: 0.0.40
codegen_flags: <defaults>
</compile_context>

<pallas_src>
import functools

import jax
import jax.numpy as jnp
from jax.experimental import pallas as pl
from jax.experimental.pallas import tpu as pltpu


def _round_up(x, n):
    return ((x + n - 1) // n) * n


def _vmem_limit_bytes():
    """Per-generation VMEM budget: physical capacity minus compiler headroom."""
    cap = 64 * 1024 * 1024  # conservative default (v7x per-TensorCore VMEM)
    try:
        info = pltpu.get_tpu_info()
        cap = int(getattr(info, "vmem_capacity_bytes", cap))
    except Exception:
        pass
    # ~110 MiB ceiling on 128 MiB parts (v5e/v6e), ~56 MiB on 64 MiB parts (v7x).
    return max(32 * 1024 * 1024, min(cap - 8 * 1024 * 1024, 110 * 1024 * 1024))


def _choose_plan(m, d_in_p, d_hid_p, d_out_p, in_bytes, out_bytes, budget,
                 force_path=None, max_hidden_tile=None):
    """Pick row tile tm (+ hidden tile th for the fallback) from a VMEM budget."""
    m8 = _round_up(max(m, 1), 8)
    tm_cands = [t for t in (2048, 1024, 512, 256, 128, 64, 32, 16, 8) if t <= m8]
    if not tm_cands:
        tm_cands = [8]
    if m8 >= 16:
        # Keep >= 2 row tiles so the "parallel" axis can span both TensorCores
        # on multi-core chips (v7x megacore).
        multi = [t for t in tm_cands if pl.cdiv(m8, t) >= 2]
        if multi:
            tm_cands = multi

    th_cands = [t for t in (4096, 2048, 1024, 512, 256, 128)
                if t <= d_hid_p and d_hid_p % t == 0]
    if d_hid_p not in th_cands:
        th_cands = [d_hid_p] + th_cands
    if max_hidden_tile is not None:
        th_cands = [t for t in th_cands if t <= max_hidden_tile] or [th_cands[-1]]

    bias_bytes = (d_hid_p + d_out_p) * 4  # biases kept in f32

    if force_path != "tiled":
        # Fast path: W1/W2 fully VMEM-resident (DMA'd once, constant index_map).
        w_res = (d_in_p * d_hid_p + d_hid_p * d_out_p) * in_bytes + bias_bytes
        for tm in tm_cands:
            need = (2 * w_res                          # conservative buffer count
                    + 2 * tm * d_in_p * in_bytes       # double-buffered x tile
                    + 2 * tm * d_out_p * out_bytes     # double-buffered o tile
                    + tm * d_hid_p * 4                 # f32 intermediate h
                    + tm * d_out_p * 4)                # f32 result before cast
            if need <= budget:
                return {"fused": True, "tm": tm, "th": d_hid_p}
        if force_path == "fused":
            return {"fused": True, "tm": tm_cands[-1], "th": d_hid_p}

    # Fallback: tile the hidden dim (reduction-last) with an f32 accumulator.
    for tm in tm_cands:
        for th in th_cands:
            need = (2 * (d_in_p * th + th * d_out_p) * in_bytes  # weight tiles
                    + 2 * bias_bytes
                    + 2 * tm * d_in_p * in_bytes
                    + 2 * tm * d_out_p * out_bytes
                    + tm * d_out_p * 4                           # acc scratch
                    + tm * th * 4)                               # f32 intermediate h
            if need <= budget:
                return {"fused": False, "tm": tm, "th": th}
    return {"fused": False, "tm": tm_cands[-1], "th": th_cands[-1]}


def _ffn_fused_kernel(x_ref, w1_ref, b1_ref, w2_ref, b2_ref, o_ref):
    # x: (tm, d_in_p)  w1: (d_in_p, H_p)  b1: (1, H_p)  w2: (H_p, d_out_p)
    # b2: (1, d_out_p) o: (tm, d_out_p).  Weights stay resident across the grid.
    h = jnp.dot(x_ref[...], w1_ref[...], preferred_element_type=jnp.float32)
    h = jnp.maximum(h + b1_ref[...], 0.0)
    out = jnp.dot(h.astype(w2_ref.dtype), w2_ref[...],
                  preferred_element_type=jnp.float32)
    o_ref[...] = (out + b2_ref[...]).astype(o_ref.dtype)


def _ffn_tiled_kernel(x_ref, w1_ref, b1_ref, w2_ref, b2_ref, o_ref, acc_ref):
    # Hidden dim tiled on grid axis 1 ("arbitrary", reduction-last):
    #   acc += relu(x @ W1[:, k] + b1[k]) @ W2[k, :]
    # Per-H-tile ReLU is exact because the d_in contraction is not tiled.
    k = pl.program_id(1)
    h = jnp.dot(x_ref[...], w1_ref[...], preferred_element_type=jnp.float32)
    h = jnp.maximum(h + b1_ref[...], 0.0)
    part = jnp.dot(h.astype(w2_ref.dtype), w2_ref[...],
                   preferred_element_type=jnp.float32)

    @pl.when(k == 0)
    def _():                      # write directly: no zero-fill + add on step 0
        acc_ref[...] = part

    @pl.when(k != 0)
    def _():
        acc_ref[...] += part

    @pl.when(k == pl.num_programs(1) - 1)
    def _():
        o_ref[...] = (acc_ref[...] + b2_ref[...]).astype(o_ref.dtype)


@functools.partial(
    jax.jit,
    static_argnames=("d_out", "vmem_limit", "force_path", "max_hidden_tile"))
def _ffn_apply(x, w1_p, b1_p, w2_p, b2_p, *, d_out, vmem_limit,
               force_path=None, max_hidden_tile=None):
    *lead, d_in = x.shape
    m = 1
    for s in lead:
        m *= int(s)
    d_in_p, d_hid_p = w1_p.shape
    d_out_p = w2_p.shape[1]
    in_bytes = jnp.dtype(w1_p.dtype).itemsize
    out_bytes = jnp.dtype(x.dtype).itemsize

    plan = _choose_plan(m, d_in_p, d_hid_p, d_out_p, in_bytes, out_bytes,
                        budget=int(vmem_limit * 0.75),
                        force_path=force_path, max_hidden_tile=max_hidden_tile)
    tm, th = plan["tm"], plan["th"]
    m_p = _round_up(max(m, 1), tm)
    nm = m_p // tm

    # Only the activations are padded/cast per call; weights were prepared once.
    x2d = jnp.pad(x.reshape(m, d_in).astype(w1_p.dtype),
                  ((0, m_p - m), (0, d_in_p - d_in)))

    params = pltpu.CompilerParams(
        dimension_semantics=(("parallel",) if plan["fused"]
                             else ("parallel", "arbitrary")),
        vmem_limit_bytes=int(vmem_limit),
    )

    if plan["fused"]:
        out2d = pl.pallas_call(
            _ffn_fused_kernel,
            out_shape=jax.ShapeDtypeStruct((m_p, d_out_p), x.dtype),
            grid_spec=pl.GridSpec(
                grid=(nm,),
                in_specs=[
                    pl.BlockSpec((tm, d_in_p), lambda i: (i, 0)),
                    # Constant index maps: weights/biases DMA'd once, resident.
                    pl.BlockSpec((d_in_p, d_hid_p), lambda i: (0, 0)),
                    pl.BlockSpec((1, d_hid_p), lambda i: (0, 0)),
                    pl.BlockSpec((d_hid_p, d_out_p), lambda i: (0, 0)),
                    pl.BlockSpec((1, d_out_p), lambda i: (0, 0)),
                ],
                out_specs=pl.BlockSpec((tm, d_out_p), lambda i: (i, 0)),
            ),
            compiler_params=params,
        )(x2d, w1_p, b1_p, w2_p, b2_p)
    else:
        nh = d_hid_p // th
        out2d = pl.pallas_call(
            _ffn_tiled_kernel,
            out_shape=jax.ShapeDtypeStruct((m_p, d_out_p), x.dtype),
            grid_spec=pl.GridSpec(
                grid=(nm, nh),
                in_specs=[
                    pl.BlockSpec((tm, d_in_p), lambda i, k: (i, 0)),
                    pl.BlockSpec((d_in_p, th), lambda i, k: (0, k)),
                    pl.BlockSpec((1, th), lambda i, k: (0, k)),
                    pl.BlockSpec((th, d_out_p), lambda i, k: (k, 0)),
                    pl.BlockSpec((1, d_out_p), lambda i, k: (0, 0)),
                ],
                out_specs=pl.BlockSpec((tm, d_out_p), lambda i, k: (i, 0)),
                scratch_shapes=[pltpu.VMEM((tm, d_out_p), jnp.float32)],
            ),
            compiler_params=params,
        )(x2d, w1_p, b1_p, w2_p, b2_p)

    return out2d[:m, :d_out].reshape(*lead, d_out)


def make_position_wise_ffn(w1, b1, w2, b2, *, compute_dtype=None,
                           force_path=None, max_hidden_tile=None):
    """Pads/casts weights once and returns a jitted apply(x).

    Weights are stored as (in_features, out_features) — transposed vs. torch's
    nn.Linear.weight — so the forward is relu(x @ w1 + b1) @ w2 + b2.
    Pass compute_dtype=jnp.bfloat16 to run the MXU in bf16 (f32 accumulation).
    """
    d_in, d_hidden = w1.shape
    d_out = w2.shape[1]
    assert w2.shape[0] == d_hidden and b1.shape == (d_hidden,) and b2.shape == (d_out,)

    cdt = jnp.dtype(compute_dtype) if compute_dtype is not None else jnp.dtype(w1.dtype)
    d_in_p = _round_up(d_in, 128)
    d_hid_p = _round_up(d_hidden, 128)
    d_out_p = _round_up(d_out, 128)

    # Padding / casting hoisted out of the per-call path (done once, here).
    w1_p = jnp.pad(w1.astype(cdt), ((0, d_in_p - d_in), (0, d_hid_p - d_hidden)))
    w2_p = jnp.pad(w2.astype(cdt), ((0, d_hid_p - d_hidden), (0, d_out_p - d_out)))
    b1_p = jnp.pad(b1.astype(jnp.float32).reshape(1, d_hidden),
                   ((0, 0), (0, d_hid_p - d_hidden)))
    b2_p = jnp.pad(b2.astype(jnp.float32).reshape(1, d_out),
                   ((0, 0), (0, d_out_p - d_out)))
    vmem_limit = _vmem_limit_bytes()

    def apply(x):
        return _ffn_apply(x, w1_p, b1_p, w2_p, b2_p, d_out=d_out,
                          vmem_limit=vmem_limit, force_path=force_path,
                          max_hidden_tile=max_hidden_tile)

    return apply


def init_params(key, d_in, d_hidden, d_out, dtype=jnp.float32):
    # Mirrors nn.Linear's U(-1/sqrt(fan_in), 1/sqrt(fan_in)) init; weights are
    # stored as (in_features, out_features) (transposed vs torch's .weight).
    k1, k2, k3, k4 = jax.random.split(key, 4)
    bound1 = 1.0 / (d_in ** 0.5)
    bound2 = 1.0 / (d_hidden ** 0.5)
    w1 = jax.random.uniform(k1, (d_in, d_hidden), dtype, -bound1, bound1)
    b1 = jax.random.uniform(k2, (d_hidden,), dtype, -bound1, bound1)
    w2 = jax.random.uniform(k3, (d_hidden, d_out), dtype, -bound2, bound2)
    b2 = jax.random.uniform(k4, (d_out,), dtype, -bound2, bound2)
    return w1, b1, w2, b2


if __name__ == "__main__":
    key = jax.random.PRNGKey(0)
    batch, seq = 2, 8
    d_in, d_hidden, d_out = 32, 256, 32

    kx, kp = jax.random.split(key)
    x = jax.random.normal(kx, (batch, seq, d_in), jnp.float32)
    w1, b1, w2, b2 = init_params(kp, d_in, d_hidden, d_out)

    # Pure-JAX reference.
    ref = (jnp.maximum(x.reshape(-1, d_in) @ w1 + b1, 0.0) @ w2 + b2)
    ref = ref.reshape(batch, seq, d_out)

    # 1) Weights-resident fused path (the common case for real FFN sizes).
    ffn = make_position_wise_ffn(w1, b1, w2, b2)
    out = jax.block_until_ready(ffn(x))
    assert out.shape == (batch, seq, d_out)
    assert jnp.allclose(out, ref, atol=1e-3, rtol=1e-3), \
        float(jnp.max(jnp.abs(out - ref)))

    # 2) H-tiled fallback path (used when weights exceed the VMEM budget);
    #    forced here with a small hidden tile to exercise the accumulator loop.
    ffn_tiled = make_position_wise_ffn(w1, b1, w2, b2,
                                       force_path="tiled", max_hidden_tile=128)
    out_t = jax.block_until_ready(ffn_tiled(x))
    assert jnp.allclose(out_t, ref, atol=1e-3, rtol=1e-3), \
        float(jnp.max(jnp.abs(out_t - ref)))

    print("KERNEL_OK")
</pallas_src>

<mosaic_0001>
module attributes {stable_mosaic.version = 11 : i64} {
  func.func @_ffn_fused_kernel(%arg0: i32, %arg1: memref<8x128xf32, #tpu.memory_space<vmem>>, %arg2: memref<128x256xf32, #tpu.memory_space<vmem>>, %arg3: memref<1x256xf32, #tpu.memory_space<vmem>>, %arg4: memref<256x128xf32, #tpu.memory_space<vmem>>, %arg5: memref<1x128xf32, #tpu.memory_space<vmem>>, %arg6: memref<8x128xf32, #tpu.memory_space<vmem>>) attributes {dimension_semantics = [#tpu.dimension_semantics<parallel>], iteration_bounds = array<i64: 2>, scalar_prefetch = 0 : i64, scratch_operands = 0 : i64, tpu.core_type = #tpu.core_type<tc>, window_params = [{transform_indices = @transform_0, window_bounds = array<i64: 8, 128>}, {pipeline_mode = #tpu.pipeline_mode<synchronous>, transform_indices = @transform_1, window_bounds = array<i64: 128, 256>}, {pipeline_mode = #tpu.pipeline_mode<synchronous>, transform_indices = @transform_2, window_bounds = array<i64: 1, 256>}, {pipeline_mode = #tpu.pipeline_mode<synchronous>, transform_indices = @transform_3, window_bounds = array<i64: 256, 128>}, {pipeline_mode = #tpu.pipeline_mode<synchronous>, transform_indices = @transform_4, window_bounds = array<i64: 1, 128>}, {transform_indices = @transform_5, window_bounds = array<i64: 8, 128>}]} {
    %c0 = arith.constant 0 : index
    %c0_0 = arith.constant 0 : index
    %0 = vector.load %arg1[%c0, %c0_0] : memref<8x128xf32, #tpu.memory_space<vmem>>, vector<8x128xf32>
    %c0_1 = arith.constant 0 : index
    %c0_2 = arith.constant 0 : index
    %1 = vector.load %arg2[%c0_1, %c0_2] : memref<128x256xf32, #tpu.memory_space<vmem>>, vector<128x256xf32>
    %cst = arith.constant dense<0.000000e+00> : vector<8x256xf32>
    %2 = tpu.matmul %0, %1, %cst {dimension_numbers = #tpu.dot_dimension_numbers<[1], [0], [0], [1], [0, 0, 1, 1], [], []>} : vector<8x128xf32>, vector<128x256xf32>, vector<8x256xf32> -> vector<8x256xf32>
    %c0_3 = arith.constant 0 : index
    %c0_4 = arith.constant 0 : index
    %3 = vector.load %arg3[%c0_3, %c0_4] : memref<1x256xf32, #tpu.memory_space<vmem>>, vector<1x256xf32>
    %4 = vector.broadcast %3 : vector<1x256xf32> to vector<8x256xf32>
    %5 = arith.addf %2, %4 : vector<8x256xf32>
    %cst_5 = arith.constant 0.000000e+00 : f32
    %6 = vector.broadcast %cst_5 : f32 to vector<8x256xf32>
    %7 = arith.maximumf %5, %6 : vector<8x256xf32>
    %c0_6 = arith.constant 0 : index
    %c0_7 = arith.constant 0 : index
    %8 = vector.load %arg4[%c0_6, %c0_7] : memref<256x128xf32, #tpu.memory_space<vmem>>, vector<256x128xf32>
    %cst_8 = arith.constant dense<0.000000e+00> : vector<8x128xf32>
    %9 = tpu.matmul %7, %8, %cst_8 {dimension_numbers = #tpu.dot_dimension_numbers<[1], [0], [0], [1], [0, 0, 1, 1], [], []>} : vector<8x256xf32>, vector<256x128xf32>, vector<8x128xf32> -> vector<8x128xf32>
    %c0_9 = arith.constant 0 : index
    %c0_10 = arith.constant 0 : index
    %10 = vector.load %arg5[%c0_9, %c0_10] : memref<1x128xf32, #tpu.memory_space<vmem>>, vector<1x128xf32>
    %11 = vector.broadcast %10 : vector<1x128xf32> to vector<8x128xf32>
    %12 = arith.addf %9, %11 : vector<8x128xf32>
    %c0_11 = arith.constant 0 : index
    %c0_12 = arith.constant 0 : index
    %13 = vector.load %arg6[%c0_11, %c0_12] : memref<8x128xf32, #tpu.memory_space<vmem>>, vector<8x128xf32>
    tpu.vector_store %arg6[%c0_11, %c0_12], %12 {strides = array<i32>} : memref<8x128xf32, #tpu.memory_space<vmem>>, vector<8x128xf32>,
    return
  }
  func.func @transform_0(%arg0: i32) -> (i32, i32) {
    %c0_i32 = arith.constant 0 : i32
    %c0_i32_0 = arith.constant 0 : i32
    return %arg0, %c0_i32 : i32, i32
  }
  func.func @transform_1(%arg0: i32) -> (i32, i32) {
    %c0_i32 = arith.constant 0 : i32
    %c0_i32_0 = arith.constant 0 : i32
    %c0_i32_1 = arith.constant 0 : i32
    return %c0_i32, %c0_i32_0 : i32, i32
  }
  func.func @transform_2(%arg0: i32) -> (i32, i32) {
    %c0_i32 = arith.constant 0 : i32
    %c0_i32_0 = arith.constant 0 : i32
    %c0_i32_1 = arith.constant 0 : i32
    return %c0_i32, %c0_i32_0 : i32, i32
  }
  func.func @transform_3(%arg0: i32) -> (i32, i32) {
    %c0_i32 = arith.constant 0 : i32
    %c0_i32_0 = arith.constant 0 : i32
    %c0_i32_1 = arith.constant 0 : i32
    return %c0_i32, %c0_i32_0 : i32, i32
  }
  func.func @transform_4(%arg0: i32) -> (i32, i32) {
    %c0_i32 = arith.constant 0 : i32
    %c0_i32_0 = arith.constant 0 : i32
    %c0_i32_1 = arith.constant 0 : i32
    return %c0_i32, %c0_i32_0 : i32, i32
  }
  func.func @transform_5(%arg0: i32) -> (i32, i32) {
    %c0_i32 = arith.constant 0 : i32
    %c0_i32_0 = arith.constant 0 : i32
    return %arg0, %c0_i32 : i32, i32
  }
}

</mosaic_0001>

<bundles_post_ra>
// kernel: _ffn_apply.1
= control target key start
LH: loop header
LB: loop body
LE: loop exit
PB: predicated region body
PF: predicated region fallthrough
CT: control target
= control target key end

     0   :  { %10 = vsyncpa [#allocation3], 0  ;;  %s917_s0 = inlined_call_operand.vmem [shape: f32[16,128], index: 0, kind: input, shape index: {}]   ;;  %s918_s1 = inlined_call_operand.hbm [shape: f32[128,256], index: 1, kind: input, shape index: {}]   ;;  %s919_s2 = inlined_call_operand.vmem [shape: f32[1,256], index: 2, kind: input, shape index: {}]   ;;  %s920_s3 = inlined_call_operand.hbm [shape: f32[256,128], index: 3, kind: input, shape index: {}]   ;;  %s921_s4 = inlined_call_operand.vmem [shape: f32[1,128], index: 4, kind: input, shape index: {}]   ;;  %s922_s5 = inlined_call_operand.vmem [shape: f32[16,128], index: 5, kind: output, shape index: {}]  }
   0x1   :  { %11 = vsyncpa [#allocation5], 0  ;;  %s809_s18 = smov 0  }
   0x2 LB: > { %s772_s19 = smov [#allocation2]   ;;  %s815_s21 = sadd.s32 4294967295, %s770_s18   ;;  %s770_s18 = sphi %s809_s18, %s17_s18  }
   0x3   : > { %s170_s20 = sshll.u32 %s772_s19, 4  ;;  %p555_p0 = scmp.ge.s32.totalorder %s770_s18, 1  ;;  %s171_s20 = int_to_ptr.vmem [resolvable:$true] %s170_s20 }
   0x4   : > { %p158_p1 = scmp.lt.s32.totalorder %s770_s18, 3  ;;  %p923_p3 = scmp.eq.s32.totalorder %s815_s21, 0 }
   0x5   : > { %s773_s23 = smov [#allocation4]   ;;  %s700_s28 = scalar_lea.hbm %s918_s1, 4096 }
   0x6   : > { %p819_p2 = pnand %p555_p0, %p158_p1  ;;  %s186_s24 = sshll.u32 %s773_s23, 4  ;;  %s832_s24 = int_to_ptr.vmem [resolvable:$true] %s186_s24 }
   0x7   : > { %p701_p6 = scmp.ne.s32.totalorder %s918_s1, %s700_s28  ;;  %p707_p10 = scmp.lt.u32.totalorder %s700_s28, %s918_s1 }
   0x8   : > { %s925_s22 = scalar_select %p819_p2, 1, 0 }
   0x9   : > { %p674_p4 = pneg %p819_p2 }
   0xb   : > { %p828_p5 = pnand %p923_p3, %p674_p4 }
   0xd   : > { %p702_p7 = pneg %p828_p5 }
   0xf   : > { %p703_p8 = pnand %p702_p7, %p701_p6 }
  0x11   : > { %p704_p9 = pneg %p703_p8 }
  0x13   : > { %p709_p11 = pnand %p707_p10, %p704_p9 }
  0x15   : > { %712 = shalt.err (!%p709_p11)
}
  0x16   : > { %s713_s8 = scalar_lea.vmem %s171_s20, 4096  ;;  %p721_p1 = scmp.lt.s32.totalorder %s171_s20, %s171_s20 }
  0x17   : > { %p714_p12 = scmp.ne.s32.totalorder %s171_s20, %s713_s8  ;;  %p722_p4 = scmp.lt.s32.totalorder %s713_s8, %s713_s8 }
  0x19   : > { %p716_p13 = pnand %p714_p12, %p702_p7  ;;  %p723_p3 = por %p722_p4, %p721_p1 }
  0x1b   : > { %p717_p0 = pneg %p716_p13 }
  0x1d   : > { %p724_p2 = pnand %p723_p3, %p717_p0 }
  0x1f   : > { %727 = shalt.err (!%p724_p2)
}
  0x20   : > { %s774_s9 = smov 256   ;;  %s775_s10 = smov 16  }
  0x21   : > { %677 = dma.hbm_to_vmem [thread:$0]  (!%p828_p5), %s918_s1, 4096, %s171_s20, [#allocation3], %s774_s9, %s774_s9, %s775_s10  }
  0x22   : > { %s728_s15 = scalar_lea.hbm %s920_s3, 4096 }
  0x23   : > { %p729_p6 = scmp.ne.s32.totalorder %s920_s3, %s728_s15  ;;  %p735_p8 = scmp.lt.u32.totalorder %s728_s15, %s920_s3 }
  0x25   : > { %p731_p2 = pnand %p729_p6, %p702_p7 }
  0x27   : > { %p732_p3 = pneg %p731_p2 }
  0x29   : > { %p737_p9 = pnand %p735_p8, %p732_p3 }
  0x2b   : > { %740 = shalt.err (!%p737_p9)
}
  0x2c   : > { %s741_s20 = scalar_lea.vmem %s832_s24, 4096  ;;  %p749_p13 = scmp.lt.s32.totalorder %s832_s24, %s832_s24 }
  0x2d   : > { %p742_p10 = scmp.ne.s32.totalorder %s832_s24, %s741_s20  ;;  %p750_p0 = scmp.lt.s32.totalorder %s741_s20, %s741_s20 }
  0x2f   : > { %p744_p11 = pnand %p742_p10, %p702_p7  ;;  %p751_p1 = por %p750_p0, %p749_p13 }
  0x31   : > { %p745_p12 = pneg %p744_p11 }
  0x33   : > { %p752_p4 = pnand %p751_p1, %p745_p12 }
  0x35   : > { %755 = shalt.err (!%p752_p4)
}
  0x36   : > { %s776_s26 = smov 128   ;;  %s777_s27 = smov 8  }
  0x37   : > { %680 = dma.hbm_to_vmem [thread:$0]  (!%p828_p5), %s920_s3, 4096, %s832_s24, [#allocation5], %s776_s26, %s776_s26, %s777_s27  }
  0x38   : > { %p927_p6 = scmp.ne.s32.totalorder %s925_s22, 0 }
  0x39   : > { %p928_p7 = scmp.eq.s32.totalorder (!%p927_p6), %s815_s21, 0 }
  0x3a   : > { %212 = sbr.rel (%p927_p6) target bundleno = 541 (0x21d), region = 40 }
  0x41   : > { %761 = dma.done.wait (%p928_p7), [#allocation3], 4096   ;;  %p929_p2 = pmov %p928_p7 }
  0x43   : > { %763 = vsyncadd (%p929_p2), [#allocation3], 4294963200  ;;  %p930_p3 = pmov %p929_p2 }
  0x44   : > { %p931_p8 = pmov %p929_p2 }
  0x45   : > { %765 = dma.done.wait (%p930_p3), [#allocation5], 4096  }
  0x46   : > { %767 = vsyncadd (%p931_p8), [#allocation5], 4294963200  ;;  %v778_v0 = vmov 0.0   ;;  %v252_v1 = vld [vmem:[#allocation2 + $0x8] sm:$0xff]  ;;  %v254_v2 = vld [vmem:[#allocation2 + $0x18] sm:$0xff]  ;;  %p242_p5 = scmp.lt.s32.totalorder %s815_s21, 1 }
  0x47   : > { %359 = vmatprep.mubr.f32.mxu0 %v778_v0  ;;  %v251_v3 = vld [vmem:[#allocation2] sm:$0xff]  ;;  %v602_v4 = vpack.c.bf16 %v254_v2, %v252_v1  ;;  %v253_v5 = vld [vmem:[#allocation2 + $0x10] sm:$0xff]  ;;  %v256_v6 = vld [vmem:[#allocation2 + $0x28] sm:$0xff] }
  0x48   : > { %v258_v7 = vld [vmem:[#allocation2 + $0x38] sm:$0xff]  ;;  %v604_v8 = vpack.c.bf16 %v253_v5, %v251_v3  ;;  %v255_v10 = vld [vmem:[#allocation2 + $0x20] sm:$0xff]  ;;  %v257_v11 = vld [vmem:[#allocation2 + $0x30] sm:$0xff]  ;;  %s933_s21 = smov (!%p242_p5, %s815_s21), 1 }
  0x49   : > { %v606_v9 = vpack.c.bf16 %v258_v7, %v256_v6  ;;  %v260_v12 = vld [vmem:[#allocation2 + $0x48] sm:$0xff]  ;;  %603 = vmatprep.subr.bf16.mxu0 %v602_v4  ;;  %v262_v13 = vld [vmem:[#allocation2 + $0x58] sm:$0xff]  ;;  %v608_v14 = vpack.c.bf16 %v257_v11, %v255_v10  ;;  %v259_v16 = vld [vmem:[#allocation2 + $0x40] sm:$0xff]  ;;  %s562_s22 = sshll.u32 %s933_s21, 3 }
  0x4a   : > { %605 = vmatpush1.bf16.msra.mxu0 %v604_v8  ;;  %v610_v15 = vpack.c.bf16 %v262_v13, %v260_v12  ;;  %v261_v17 = vld [vmem:[#allocation2 + $0x50] sm:$0xff]  ;;  %v264_v18 = vld [vmem:[#allocation2 + $0x68] sm:$0xff]  ;;  %v266_v19 = vld [vmem:[#allocation2 + $0x78] sm:$0xff]  ;;  %s245_s30 = scalar_lea.vmem %s917_s0, %s562_s22  ;;  %s249_s12 = scalar_lea.vmem %s922_s5, %s562_s22 }
  0x4b   : > { %607 = vmatprep.subr.bf16.mxu0 %v606_v9  ;;  %v612_v20 = vpack.c.bf16 %v261_v17, %v259_v16  ;;  %v614_v21 = vpack.c.bf16 %v266_v19, %v264_v18  ;;  %v263_v22 = vld [vmem:[#allocation2 + $0x60] sm:$0xff]  ;;  %v265_v23 = vld [vmem:[#allocation2 + $0x70] sm:$0xff]  ;;  %v268_v24 = vld [vmem:[#allocation2 + $0x88] sm:$0xff] }
  0x4c   : > { %v270_v25 = vld [vmem:[#allocation2 + $0x98] sm:$0xff]  ;;  %v267_v26 = vld [vmem:[#allocation2 + $0x80] sm:$0xff]  ;;  %v269_v27 = vld [vmem:[#allocation2 + $0x90] sm:$0xff]  ;;  %v616_v31 = vpack.c.bf16 %v265_v23, %v263_v22 }
  0x4d   : > { %v384_v28 = vld [vmem:[#allocation4 + $0x80] sm:$0xff]  ;;  %v385_v29 = vld [vmem:[#allocation4 + $0x88] sm:$0xff]  ;;  %v386_v34 = vld [vmem:[#allocation4 + $0x90] sm:$0xff]  ;;  %v618_v36 = vpack.c.bf16 %v270_v25, %v268_v24  ;;  %v620_v46 = vpack.c.bf16 %v269_v27, %v267_v26 }
  0x4e   : > { %609 = vmatpush1.bf16.msra.mxu0 %v608_v14  ;;  %v368_v30 = vld [vmem:[#allocation4] sm:$0xff]  ;;  %v634_v32 = vpack.c.bf16 %v385_v29, %v384_v28  ;;  %v369_v33 = vld [vmem:[#allocation4 + $0x8] sm:$0xff]  ;;  %v387_v35 = vld [vmem:[#allocation4 + $0x98] sm:$0xff] }
  0x4f   : > { %611 = vmatprep.subr.bf16.mxu0 %v610_v15  ;;  %v636_v37 = vpack.c.bf16 %v369_v33, %v368_v30  ;;  %v638_v38 = vpack.c.bf16 %v387_v35, %v386_v34  ;;  %v370_v39 = vld [vmem:[#allocation4 + $0x10] sm:$0xff]  ;;  %v371_v40 = vld [vmem:[#allocation4 + $0x18] sm:$0xff]  ;;  %v388_v41 = vld [vmem:[#allocation4 + $0xa0] sm:$0xff]  ;;  %v285_v34 = vlaneseq }
  0x50   : > { %v272_v42 = vld [vmem:[#allocation2 + $0xa8] sm:$0xff]  ;;  %v274_v43 = vld [vmem:[#allocation2 + $0xb8] sm:$0xff]  ;;  %635 = vmatprep.subr.bf16.mxu1 %v634_v32  ;;  %v640_v45 = vpack.c.bf16 %v371_v40, %v370_v39  ;;  %v271_v47 = vld [vmem:[#allocation2 + $0xa0] sm:$0xff] }
  0x51   : > { %v389_v44 = vld [vmem:[#allocation4 + $0xa8] sm:$0xff]  ;;  %637 = vmatpush3.bf16.msra.mxu1 %v636_v37  ;;  %v372_v49 = vld [vmem:[#allocation4 + $0x20] sm:$0xff]  ;;  %v622_v51 = vpack.c.bf16 %v274_v43, %v272_v42  ;;  %v273_v52 = vld [vmem:[#allocation2 + $0xb0] sm:$0xff]  ;;  %v286_v35 = vshrl.u32 %v285_v34, 7 }
  0x52   : > { %613 = vmatpush1.bf16.msra.mxu0 %v612_v20  ;;  %639 = vmatprep.subr.bf16.mxu1 %v638_v38  ;;  %v642_v48 = vpack.c.bf16 %v389_v44, %v388_v41  ;;  %v373_v50 = vld [vmem:[#allocation4 + $0x28] sm:$0xff]  ;;  %v390_v53 = vld [vmem:[#allocation4 + $0xb0] sm:$0xff]  ;;  %v391_v54 = vld [vmem:[#allocation4 + $0xb8] sm:$0xff]  ;;  %v624_v58 = vpack.c.bf16 %v273_v52, %v271_v47 }
  0x53   : > { %615 = vmatprep.subr.bf16.mxu0 %v614_v21  ;;  %v276_v55 = vld [vmem:[#allocation2 + $0xc8] sm:$0xff]  ;;  %v278_v56 = vld [vmem:[#allocation2 + $0xd8] sm:$0xff]  ;;  %v644_v57 = vpack.c.bf16 %v373_v50, %v372_v49  ;;  %v275_v59 = vld [vmem:[#allocation2 + $0xc0] sm:$0xff]  ;;  %v646_v60 = vpack.c.bf16 %v391_v54, %v390_v53  ;;  %v291_v38 = vsub.s32 1, %v286_v35 }
  0x54   : > { %v374_v61 = vld [vmem:[#allocation4 + $0x30] sm:$0xff]  ;;  %v375_v62 = vld [vmem:[#allocation4 + $0x38] sm:$0xff]  ;;  %v626_v63 = vpack.c.bf16 %v278_v56, %v276_v55  ;;  %v392_v1 = vld [vmem:[#allocation4 + $0xc0] sm:$0xff] }
  0x55   : > { %641 = vmatpush3.bf16.msra.mxu1 %v640_v45  ;;  %v277_v0 = vld [vmem:[#allocation2 + $0xd0] sm:$0xff]  ;;  %v393_v2 = vld [vmem:[#allocation4 + $0xc8] sm:$0xff]  ;;  %v282_v4 = vld [vmem:[#allocation2 + $0xf8] sm:$0xff]  ;;  %v648_v5 = vpack.c.bf16 %v375_v62, %v374_v61 }
  0x56   : > { %617 = vmatpush1.bf16.msra.mxu0 %v616_v31  ;;  %643 = vmatprep.subr.bf16.mxu1 %v642_v48  ;;  %v280_v3 = vld [vmem:[#allocation2 + $0xe8] sm:$0xff]  ;;  %v628_v6 = vpack.c.bf16 %v277_v0, %v275_v59  ;;  %v279_v7 = vld [vmem:[#allocation2 + $0xe0] sm:$0xff]  ;;  %v650_v8 = vpack.c.bf16 %v393_v2, %v392_v1  ;;  %v281_v12 = vld [vmem:[#allocation2 + $0xf0] sm:$0xff] }
  0x57   : > { %619 = vmatprep.subr.bf16.mxu0 %v618_v36  ;;  %v376_v9 = vld [vmem:[#allocation4 + $0x40] sm:$0xff]  ;;  %v377_v10 = vld [vmem:[#allocation4 + $0x48] sm:$0xff]  ;;  %v630_v11 = vpack.c.bf16 %v282_v4, %v280_v3  ;;  %v394_v13 = vld [vmem:[#allocation4 + $0xd0] sm:$0xff]  ;;  %v632_v16 = vpack.c.bf16 %v281_v12, %v279_v7  ;;  %v287_v36 = vsub.s32 0, %v286_v35 }
  0x58   : > { %v395_v14 = vld [vmem:[#allocation4 + $0xd8] sm:$0xff]  ;;  %v652_v15 = vpack.c.bf16 %v377_v10, %v376_v9  ;;  %v378_v18 = vld [vmem:[#allocation4 + $0x50] sm:$0xff]  ;;  %v396_v20 = vld [vmem:[#allocation4 + $0xe0] sm:$0xff] }
  0x59   : > { %645 = vmatpush3.bf16.msra.mxu1 %v644_v57  ;;  %v654_v17 = vpack.c.bf16 %v395_v14, %v394_v13  ;;  %v379_v19 = vld [vmem:[#allocation4 + $0x58] sm:$0xff]  ;;  %v397_v21 = vld [vmem:[#allocation4 + $0xe8] sm:$0xff]  ;;  %v250_v23 = vld [vmem:[%s245_s30] sm:$0xff] }
  0x5a   : > { %621 = vmatpush1.bf16.msra.mxu0 %v620_v46  ;;  %647 = vmatprep.subr.bf16.mxu1 %v646_v60  ;;  %v656_v22 = vpack.c.bf16 %v379_v19, %v378_v18  ;;  %v658_v24 = vpack.c.bf16 %v397_v21, %v396_v20  ;;  %v380_v25 = vld [vmem:[#allocation4 + $0x60] sm:$0xff]  ;;  %v381_v26 = vld [vmem:[#allocation4 + $0x68] sm:$0xff]  ;;  %v398_v28 = vld [vmem:[#allocation4 + $0xf0] sm:$0xff] }
  0x5b   : > { %623 = vmatprep.subr.bf16.mxu0 %v622_v51  ;;  %v660_v27 = vpack.c.bf16 %v381_v26, %v380_v25  ;;  %v399_v29 = vld [vmem:[#allocation4 + $0xf8] sm:$0xff]  ;;  %v382_v31 = vld [vmem:[#allocation4 + $0x70] sm:$0xff]  ;;  %v283_v37 = vld [vmem:[%s919_s2] sm:$0x3] }
  0x5c   : > { %v662_v30 = vpack.c.bf16 %v399_v29, %v398_v28  ;;  %v383_v32 = vld [vmem:[#allocation4 + $0x78] sm:$0xff]  ;;  %v288_v39 = vrot.slane %v283_v37, %v287_v36  ;;  %v292_v40 = vrot.slane %v283_v37, %v291_v38  ;;  %v564_v48 = vld [vmem:[%s921_s4] ss:$0 sm:$0xff] }
  0x5d   : > { %649 = vmatpush3.bf16.msra.mxu1 %v648_v5  ;;  %v664_v33 = vpack.c.bf16 %v383_v32, %v382_v31 }
  0x5e   : > { %625 = vmatpush1.bf16.msra.mxu0 %v624_v58  ;;  %651 = vmatprep.subr.bf16.mxu1 %v650_v8 }
  0x5f   : > { %627 = vmatprep.subr.bf16.mxu0 %v626_v63 }
  0x61   : > { %653 = vmatpush3.bf16.msra.mxu1 %v652_v15 }
  0x62   : > { %629 = vmatpush1.bf16.msra.mxu0 %v628_v6  ;;  %655 = vmatprep.subr.bf16.mxu1 %v654_v17 }
  0x63   : > { %631 = vmatprep.subr.bf16.mxu0 %v630_v11 }
  0x65   : > { %657 = vmatpush3.bf16.msra.mxu1 %v656_v22 }
  0x66   : > { %633 = vmatpush1.bf16.msra.mxu0 %v632_v16  ;;  %659 = vmatprep.subr.bf16.mxu1 %v658_v24 }
  0x69   : > { %360 = vmatmul.mubr.f32.vlgmr.msra.gmra.mrb[0].mxu0 %v250_v23  ;;  %661 = vmatpush3.bf16.msra.mxu1 %v660_v27 }
  0x6a   : > { %663 = vmatprep.subr.bf16.mxu1 %v662_v30 }
  0x6d   : > { %665 = vmatpush3.bf16.msra.mxu1 %v664_v33 }
 0x13c   : > { %v361_v41 = vpop.f32.mrb[0].mxu0 }
 0x13d   : > { %v362_v42 = vadd.f32 %v361_v41, %v288_v39  ;;  %v363_v43 = vpop.f32.mrb[1].mxu0 }
 0x13e   : > { %v364_v44 = vadd.f32 %v363_v43, %v292_v40 }
 0x13f   : > { %v366_v46 = vmax.f32 %v362_v42, 0.0 }
 0x140   : > { %v367_v45 = vmax.f32 %v364_v44, 0.0 }
 0x142   : > { %471 = vmatprep.mubr.f32.mxu1 %v367_v45 }
 0x143   : > { %472 = vmatmul.mubr.f32.vlgmr.msra.gmra.mrb[0].mxu1 %v366_v46 }
 0x216   : > { %v599_v47 = vpop.f32.mrb[0].mxu1 }
 0x217   : > { %v600_v49 = vpop.f32.mrb[1].mxu1 }
 0x218   : > { %v601_v50 = vadd.f32 %v600_v49, %v599_v47 }
 0x21a   : > { %v474_v51 = vadd.f32 %v601_v50, %v564_v48 }
 0x21c   : > { %477 = vst [vmem:[%s249_s12] sm:$0xff] %v474_v51 }
 0x21d PF: > { %s17_s18 = sadd.s32 1, %s770_s18  }
 0x21e   : > { %p14_p9 = scmp.ge.s32.totalorder %s17_s18, 4  }
 0x220   :  { %16 = sbr.rel (!%p14_p9) target bundleno = 2 (0x2), region = 79 }
 0x227   :  { %497 = vsyncpa [#allocation3], 1 }
 0x228   :  { %499 = vsyncpa [#allocation3 + $0x1], 1 }
 0x229   :  { %500 = vsyncpa [#allocation5], 1 }

</bundles_post_ra>
